<compile_context>
chip_gen: v6e
topology: v6e:2x2x1
jax: 0.10.0
libtpu: 0.0.40
codegen_flags: <defaults>
</compile_context>

<pallas_src>
import functools

import jax
import jax.numpy as jnp
from jax.experimental import pallas as pl
from jax.experimental.pallas import tpu as pltpu

_PAD_C = 128  # lane-dense channel padding


def _pad_up(c, m=_PAD_C):
    return ((c + m - 1) // m) * m


def _pick_vmem_limit():
    try:
        info = pltpu.get_tpu_info()
        phys = int(getattr(info, "vmem_capacity_bytes", 128 << 20))
    except Exception:
        phys = 128 << 20
    # v7x: 64 MiB / TensorCore -> leave headroom; v5e/v6e: 128 MiB.
    return (44 << 20) if phys <= (64 << 20) else (64 << 20)


_VMEM_LIMIT = _pick_vmem_limit()


# ---------------------------------------------------------------------------
# Fused kernel: sum-of-taps matmul + BN scale/shift (+residual) (+ReLU) (+pool)
# ---------------------------------------------------------------------------
def _fused_kernel(x_ref, w_ref, s_ref, b_ref, *rest,
                  taps, ho, wo, relu, has_res, pool_n, inv_hw):
    # x_ref : (1, P, Hs, Ws, Cin)   padded activation / stride-2 phases / flat slab
    # w_ref : (T, Cin, CoutP)       one (Cin, CoutP) weight slice per tap
    # s_ref / b_ref : (1, CoutP)    folded BN scale / shift (f32)
    # rest  : [res_ref (M, CoutP)], then the single output ref:
    #         feat (M, CoutP) bf16            if pool_n == 0
    #         pooled (pool_n, CoutP) f32      if pool_n  > 0
    if has_res:
        r_ref, o_ref = rest
    else:
        (o_ref,) = rest

    m = ho * wo
    cin = x_ref.shape[-1]
    cout = w_ref.shape[-1]

    xblk = x_ref[...]                                  # whole block (VMEM resident)
    acc = jnp.zeros((m, cout), jnp.float32)
    for t, (p, oy, ox) in enumerate(taps):             # static tap loop (<= 9)
        xt = xblk[0, p, oy:oy + ho, ox:ox + wo, :].reshape(m, cin)
        acc = acc + jnp.dot(xt, w_ref[t], preferred_element_type=jnp.float32)

    out = acc * s_ref[...] + b_ref[...]                # f32 BN epilogue
    if has_res:
        out = out + r_ref[...].astype(jnp.float32)     # fused residual add
    if relu:
        out = jnp.maximum(out, 0.0)

    if pool_n:                                         # fused global average pool
        rows = m // pool_n
        for b in range(pool_n):
            seg = jnp.sum(out[b * rows:(b + 1) * rows, :], axis=0, keepdims=True)
            o_ref[b:b + 1, :] = (seg * inv_hw).astype(o_ref.dtype)
    else:
        o_ref[...] = out.astype(o_ref.dtype)


def _conv_pallas(x5, w3, scale, shift, taps, ho, wo, residual2d, relu, pool_n,
                 feat_dtype=jnp.bfloat16):
    """Run the fused kernel.  Grid = samples (G); weight fully resident."""
    G, P, Hs, Ws, Cin = x5.shape
    T, _, CoutP = w3.shape
    m = ho * wo
    has_res = residual2d is not None

    in_specs = [
        pl.BlockSpec((1, P, Hs, Ws, Cin), lambda i: (i, 0, 0, 0, 0)),
        pl.BlockSpec((T, Cin, CoutP), lambda i: (0, 0, 0)),   # resident weight
        pl.BlockSpec((1, CoutP), lambda i: (0, 0)),
        pl.BlockSpec((1, CoutP), lambda i: (0, 0)),
    ]
    args = [x5, w3, scale, shift]
    if has_res:
        in_specs.append(pl.BlockSpec((m, CoutP), lambda i: (i, 0)))
        args.append(residual2d)

    if pool_n:
        assert G == 1, "fused pooling uses the single-step flat path"
        out_shape = jax.ShapeDtypeStruct((pool_n, CoutP), jnp.float32)
        out_spec = pl.BlockSpec((pool_n, CoutP), lambda i: (0, 0))
        inv_hw = 1.0 / float(m // pool_n)
    else:
        out_shape = jax.ShapeDtypeStruct((G * m, CoutP), feat_dtype)
        out_spec = pl.BlockSpec((m, CoutP), lambda i: (i, 0))
        inv_hw = 1.0

    kernel = functools.partial(
        _fused_kernel, taps=tuple(taps), ho=ho, wo=wo, relu=relu,
        has_res=has_res, pool_n=pool_n, inv_hw=inv_hw)

    return pl.pallas_call(
        kernel,
        out_shape=out_shape,
        grid_spec=pltpu.PrefetchScalarGridSpec(
            num_scalar_prefetch=0,
            grid=(G,),
            in_specs=in_specs,
            out_specs=out_spec,
        ),
        compiler_params=pltpu.CompilerParams(
            dimension_semantics=("parallel",),
            vmem_limit_bytes=_VMEM_LIMIT,
        ),
    )(*args)


# ---------------------------------------------------------------------------
# One-time lowering probe for the implicit-GEMM path (in-kernel patch reshape)
# ---------------------------------------------------------------------------
_IMPLICIT_OK = None


def _implicit_ok():
    global _IMPLICIT_OK
    if _IMPLICIT_OK is None:
        try:
            x5 = jnp.zeros((1, 2, 9, 9, 128), jnp.bfloat16)
            w3 = jnp.zeros((4, 128, 128), jnp.bfloat16)
            sc = jnp.ones((1, 128), jnp.float32)
            sh = jnp.zeros((1, 128), jnp.float32)
            taps = [(0, 0, 0), (1, 0, 1), (0, 1, 0), (1, 1, 1)]
            out = _conv_pallas(x5, w3, sc, sh, taps, 8, 8, None, True, 0)
            jax.block_until_ready(out)
            _IMPLICIT_OK = True
        except Exception:
            _IMPLICIT_OK = False   # fall back to flat GEMM everywhere
    return _IMPLICIT_OK


# ---------------------------------------------------------------------------
# Plain-JAX glue: BN folding, CondConv mask
# ---------------------------------------------------------------------------
def bn_fold(gamma, beta, mean, var, eps=1e-5):
    s = gamma / jnp.sqrt(var + eps)
    return s, beta - mean * s


def cond_mask(c_out, c_in):
    # filter_in_channels = round(linspace(1, c_in, steps=c_out))
    fic = jnp.round(jnp.linspace(1.0, float(c_in), c_out)).astype(jnp.int32)
    return (jnp.arange(c_in)[None, :] < fic[:, None]).astype(jnp.float32)


# ---------------------------------------------------------------------------
# Conv wrapper: chooses implicit-GEMM or flat-GEMM presentation
# ---------------------------------------------------------------------------
def conv_bn_act(x_nhwc, cp, residual2d=None, emit_pool=False):
    """x_nhwc: (N, H, W, CinPad) bf16.  Returns (feat4d_or_None, pooled_or_None)."""
    N, H, W, Cin = x_nhwc.shape
    kh, kw, s, pad, relu = cp['kh'], cp['kw'], cp['stride'], cp['pad'], cp['relu']
    Ho = (H + 2 * pad - kh) // s + 1
    Wo = (W + 2 * pad - kw) // s + 1
    coutp = cp['w'].shape[-1]

    use_implicit = (not emit_pool and kh == 3 and kw == 3 and pad == 1
                    and s in (1, 2) and Wo % 8 == 0 and Cin % 128 == 0
                    and (s == 1 or (H + 2 * pad) % 2 == 0)
                    and _implicit_ok())

    if use_implicit:
        xp = jnp.pad(x_nhwc, ((0, 0), (pad, pad), (pad, pad), (0, 0)))
        Hp, Wp = H + 2 * pad, W + 2 * pad
        if s == 1:
            x5 = xp.reshape(N, 1, Hp, Wp, Cin)
            taps = [(0, dy, dx) for dy in range(3) for dx in range(3)]
        else:  # stride 2: 2x2 phase decomposition -> contiguous in-kernel slices
            x5 = xp.reshape(N, Hp // 2, 2, Wp // 2, 2, Cin)
            x5 = jnp.transpose(x5, (0, 2, 4, 1, 3, 5)).reshape(
                N, 4, Hp // 2, Wp // 2, Cin)
            taps = [((dy % 2) * 2 + (dx % 2), dy // 2, dx // 2)
                    for dy in range(3) for dx in range(3)]
        feat = _conv_pallas(x5, cp['w'], cp['scale'], cp['shift'], taps,
                            Ho, Wo, residual2d, relu, pool_n=0)
        return feat.reshape(N, Ho, Wo, coutp), None
        # TODO(synk): fold the jnp.pad / phase transpose into the kernel via
        # halo DMA (memory_space=pl.ANY) to drop the remaining padded copy.

    # Flat path: 1x1 convs, unaligned/tiny maps, the stem (Cin=3) and fallback.
    if kh == 1 and kw == 1:
        slab = x_nhwc[:, ::s, ::s, :].reshape(N * Ho * Wo, Cin)
        K = Cin
    else:
        xp = jnp.pad(x_nhwc, ((0, 0), (pad, pad), (pad, pad), (0, 0)))
        cols = []
        for dy in range(kh):
            for dx in range(kw):
                cols.append(xp[:, dy:dy + s * (Ho - 1) + 1:s,
                               dx:dx + s * (Wo - 1) + 1:s, :])
        slab = jnp.concatenate(cols, axis=-1).reshape(N * Ho * Wo, kh * kw * Cin)
        K = kh * kw * Cin
        # TODO(synk): this im2col slab survives only for tiny/unaligned maps
        # (4x4 / 2x2 tails) where its HBM cost is negligible.
    x5 = slab.reshape(1, 1, 1, N * Ho * Wo, K)
    w3 = cp['w'].reshape(1, K, coutp)
    taps = [(0, 0, 0)]
    pool_n = N if emit_pool else 0
    out = _conv_pallas(x5, w3, cp['scale'], cp['shift'], taps,
                       1, N * Ho * Wo, residual2d, relu, pool_n=pool_n)
    if emit_pool:
        return None, out                       # (N, CoutP) f32, already averaged
    return out.reshape(N, Ho, Wo, coutp), None


# ---------------------------------------------------------------------------
# Model forward
# ---------------------------------------------------------------------------
def block_forward(x, bp, last=False):
    """CondBasicBlock (expansion=1), eval / 'standard' mode."""
    out1, _ = conv_bn_act(x, bp['conv1'])                     # conv+BN+ReLU fused
    if 'shortcut' in bp:
        sc, _ = conv_bn_act(x, bp['shortcut'])                # conv1x1+BN fused
    else:
        sc = x
    N, Ho, Wo, C = sc.shape
    res2d = sc.reshape(N * Ho * Wo, C)
    # conv2 + BN + residual + ReLU (+ global avg pool for the last block) fused
    feat, pooled = conv_bn_act(out1, bp['conv2'], residual2d=res2d,
                               emit_pool=last)
    return pooled if last else feat


def cond_resnet_forward(x_nchw, params):
    x = jnp.transpose(x_nchw, (0, 2, 3, 1)).astype(jnp.bfloat16)   # NCHW -> NHWC bf16
    out, _ = conv_bn_act(x, params['stem'])

    blocks = [bp for layer in params['layers'] for bp in layer]
    for idx, bp in enumerate(blocks):
        out = block_forward(out, bp, last=(idx == len(blocks) - 1))

    pooled = out[:, :params['feat_dim']]                    # drop channel padding
    feat = pooled[:, params['fc_k']:]                       # eval-path slicing
    logits = jnp.dot(feat, params['linear_w_t']) + params['linear_bias']
    return logits
    # TODO(synk): training-mode dict-of-heads output (_fc_k_fractions) and the
    # CondConv 'benchmark' per-filter loop mode are not reproduced here.


# ---------------------------------------------------------------------------
# Deterministic parameter init + eval-time constant folding (done ONCE here)
# ---------------------------------------------------------------------------
def init_params(key, num_blocks=(1, 1, 1, 1), num_classes=10, extension=1,
                k_fraction=1.0):
    keys = iter(jax.random.split(key, 512))

    def nk():
        return next(keys)

    def bn(c):
        gamma = 1.0 + 0.1 * jax.random.normal(nk(), (c,), jnp.float32)
        beta = 0.1 * jax.random.normal(nk(), (c,), jnp.float32)
        mean = 0.1 * jax.random.normal(nk(), (c,), jnp.float32)
        var = jnp.abs(1.0 + 0.1 * jax.random.normal(nk(), (c,), jnp.float32))
        return gamma, beta, mean, var

    def prep_conv(c_out, c_in_real, c_in_pad, k, stride, pad, relu, masked):
        fan_in = c_in_real * k * k
        w = jax.random.normal(nk(), (c_out, c_in_real, k, k),
                              jnp.float32) / jnp.sqrt(fan_in)
        if masked:
            # CondConv triangular mask; eval mode k = out_channels so the extra
            # weight[k:] = 0 of the reference is a no-op.
            w = w * cond_mask(c_out, c_in_real)[:, :, None, None]
        c_out_pad = _pad_up(c_out)
        wt = jnp.transpose(w, (2, 3, 1, 0)).reshape(k * k, c_in_real, c_out)
        w_full = jnp.zeros((k * k, c_in_pad, c_out_pad), jnp.float32)
        w_full = w_full.at[:, :c_in_real, :c_out].set(wt)
        sc, sh = bn_fold(*bn(c_out))
        scale = jnp.ones((c_out_pad,), jnp.float32).at[:c_out].set(sc)
        shift = jnp.zeros((c_out_pad,), jnp.float32).at[:c_out].set(sh)
        cp = {
            'w': w_full.astype(jnp.bfloat16),          # (k*k, CinPad, CoutPad)
            'scale': scale.reshape(1, c_out_pad),
            'shift': shift.reshape(1, c_out_pad),
            'kh': k, 'kw': k, 'stride': stride, 'pad': pad, 'relu': relu,
        }
        return cp, c_out, c_out_pad

    nc = 64 * extension
    params = {}

    # stem: plain Conv2d (no mask, no bias) + BN + ReLU
    params['stem'], in_real, in_pad = prep_conv(nc, 3, 3, 3, 1, 1, True,
                                                masked=False)

    layers = []
    for mult, nb, stride0 in zip((1, 2, 4, 8), num_blocks, (1, 2, 2, 2)):
        planes = mult * nc
        blocks = []
        for stride in [stride0] + [1] * (nb - 1):
            bp = {}
            bp['conv1'], _, c1p = prep_conv(planes, in_real, in_pad, 3,
                                            stride, 1, True, True)
            bp['conv2'], out_real, out_pad = prep_conv(planes, planes, c1p, 3,
                                                       1, 1, True, True)
            if stride != 1 or in_real != planes:
                bp['shortcut'], _, _ = prep_conv(planes, in_real, in_pad, 1,
                                                 stride, 0, False, True)
            in_real, in_pad = out_real, out_pad
            blocks.append(bp)
        layers.append(blocks)
    params['layers'] = layers

    # classifier (eval-path slicing folded at init; runs as plain jnp.dot)
    feat_dim = 8 * nc  # block.expansion == 1
    lw = jax.random.normal(nk(), (num_classes, feat_dim),
                           jnp.float32) / jnp.sqrt(feat_dim)
    lb = 0.01 * jax.random.normal(nk(), (num_classes,), jnp.float32)
    k = int(round(num_classes * k_fraction))
    params['feat_dim'] = feat_dim
    params['fc_k'] = k
    params['linear_w_t'] = jnp.transpose(lw[:, k:])          # (feat_dim - k, classes)
    params['linear_bias'] = lb.reshape(1, num_classes)
    return params


# ---------------------------------------------------------------------------
if __name__ == "__main__":
    key = jax.random.PRNGKey(0)
    kp, kx = jax.random.split(key)
    params = init_params(kp, num_blocks=(1, 1, 1, 1), num_classes=10,
                         extension=1, k_fraction=1.0)
    x = jax.random.normal(kx, (2, 3, 16, 16), jnp.float32)   # NCHW like PyTorch
    logits = cond_resnet_forward(x, params)
    jax.block_until_ready(logits)
    assert logits.shape == (2, 10), logits.shape
    print("KERNEL_OK")
</pallas_src>

<mosaic_0001>
module attributes {stable_mosaic.version = 11 : i64} {
  func.func @_fused_kernel(%arg0: i32, %arg1: memref<1x1x1x512x27xbf16, #tpu.memory_space<vmem>>, %arg2: memref<1x27x128xbf16, #tpu.memory_space<vmem>>, %arg3: memref<1x128xf32, #tpu.memory_space<vmem>>, %arg4: memref<1x128xf32, #tpu.memory_space<vmem>>, %arg5: memref<512x128xbf16, #tpu.memory_space<vmem>>) attributes {dimension_semantics = [#tpu.dimension_semantics<parallel>], iteration_bounds = array<i64: 1>, scalar_prefetch = 0 : i64, scratch_operands = 0 : i64, tpu.core_type = #tpu.core_type<tc>, window_params = [{transform_indices = @transform_0, window_bounds = array<i64: 1, 1, 1, 512, 27>}, {pipeline_mode = #tpu.pipeline_mode<synchronous>, transform_indices = @transform_1, window_bounds = array<i64: 1, 27, 128>}, {pipeline_mode = #tpu.pipeline_mode<synchronous>, transform_indices = @transform_2, window_bounds = array<i64: 1, 128>}, {pipeline_mode = #tpu.pipeline_mode<synchronous>, transform_indices = @transform_3, window_bounds = array<i64: 1, 128>}, {transform_indices = @transform_4, window_bounds = array<i64: 512, 128>}]} {
    %c0 = arith.constant 0 : index
    %c0_0 = arith.constant 0 : index
    %c0_1 = arith.constant 0 : index
    %c0_2 = arith.constant 0 : index
    %c0_3 = arith.constant 0 : index
    %0 = vector.load %arg1[%c0, %c0_0, %c0_1, %c0_2, %c0_3] : memref<1x1x1x512x27xbf16, #tpu.memory_space<vmem>>, vector<1x1x1x512x27xbf16>
    %cst = arith.constant 0.000000e+00 : f32
    %1 = vector.broadcast %cst : f32 to vector<512x128xf32>
    %2 = vector.shape_cast %0 : vector<1x1x1x512x27xbf16> to vector<1x512x27xbf16>
    %3 = vector.shape_cast %2 : vector<1x512x27xbf16> to vector<512x27xbf16>
    %c0_4 = arith.constant 0 : index
    %c0_5 = arith.constant 0 : index
    %c0_6 = arith.constant 0 : index
    %4 = vector.load %arg2[%c0_4, %c0_5, %c0_6] : memref<1x27x128xbf16, #tpu.memory_space<vmem>>, vector<1x27x128xbf16>
    %5 = vector.shape_cast %4 : vector<1x27x128xbf16> to vector<27x128xbf16>
    %cst_7 = arith.constant dense<0.000000e+00> : vector<512x128xf32>
    %6 = tpu.matmul %3, %5, %cst_7 {dimension_numbers = #tpu.dot_dimension_numbers<[1], [0], [0], [1], [0, 0, 1, 1], [], []>} : vector<512x27xbf16>, vector<27x128xbf16>, vector<512x128xf32> -> vector<512x128xf32>
    %7 = arith.addf %1, %6 : vector<512x128xf32>
    %c0_8 = arith.constant 0 : index
    %c0_9 = arith.constant 0 : index
    %8 = vector.load %arg3[%c0_8, %c0_9] : memref<1x128xf32, #tpu.memory_space<vmem>>, vector<1x128xf32>
    %9 = vector.broadcast %8 : vector<1x128xf32> to vector<512x128xf32>
    %10 = arith.mulf %7, %9 : vector<512x128xf32>
    %c0_10 = arith.constant 0 : index
    %c0_11 = arith.constant 0 : index
    %11 = vector.load %arg4[%c0_10, %c0_11] : memref<1x128xf32, #tpu.memory_space<vmem>>, vector<1x128xf32>
    %12 = vector.broadcast %11 : vector<1x128xf32> to vector<512x128xf32>
    %13 = arith.addf %10, %12 : vector<512x128xf32>
    %cst_12 = arith.constant 0.000000e+00 : f32
    %14 = vector.broadcast %cst_12 : f32 to vector<512x128xf32>
    %15 = arith.maximumf %13, %14 : vector<512x128xf32>
    %16 = arith.truncf %15 : vector<512x128xf32> to vector<512x128xbf16>
    %c0_13 = arith.constant 0 : index
    %c0_14 = arith.constant 0 : index
    %17 = vector.load %arg5[%c0_13, %c0_14] : memref<512x128xbf16, #tpu.memory_space<vmem>>, vector<512x128xbf16>
    tpu.vector_store %arg5[%c0_13, %c0_14], %16 {strides = array<i32>} : memref<512x128xbf16, #tpu.memory_space<vmem>>, vector<512x128xbf16>,
    return
  }
  func.func @transform_0(%arg0: i32) -> (i32, i32, i32, i32, i32) {
    %c0_i32 = arith.constant 0 : i32
    %c0_i32_0 = arith.constant 0 : i32
    %c0_i32_1 = arith.constant 0 : i32
    %c0_i32_2 = arith.constant 0 : i32
    %c0_i32_3 = arith.constant 0 : i32
    return %arg0, %c0_i32, %c0_i32_0, %c0_i32_1, %c0_i32_2 : i32, i32, i32, i32, i32
  }
  func.func @transform_1(%arg0: i32) -> (i32, i32, i32) {
    %c0_i32 = arith.constant 0 : i32
    %c0_i32_0 = arith.constant 0 : i32
    %c0_i32_1 = arith.constant 0 : i32
    %c0_i32_2 = arith.constant 0 : i32
    return %c0_i32, %c0_i32_0, %c0_i32_1 : i32, i32, i32
  }
  func.func @transform_2(%arg0: i32) -> (i32, i32) {
    %c0_i32 = arith.constant 0 : i32
    %c0_i32_0 = arith.constant 0 : i32
    %c0_i32_1 = arith.constant 0 : i32
    return %c0_i32, %c0_i32_0 : i32, i32
  }
  func.func @transform_3(%arg0: i32) -> (i32, i32) {
    %c0_i32 = arith.constant 0 : i32
    %c0_i32_0 = arith.constant 0 : i32
    %c0_i32_1 = arith.constant 0 : i32
    return %c0_i32, %c0_i32_0 : i32, i32
  }
  func.func @transform_4(%arg0: i32) -> (i32, i32) {
    %c0_i32 = arith.constant 0 : i32
    %c0_i32_0 = arith.constant 0 : i32
    return %arg0, %c0_i32 : i32, i32
  }
}

</mosaic_0001>

<bundles_post_ra>
// kernel: tpu_custom_call.1
= control target key start
LH: loop header
LB: loop body
LE: loop exit
PB: predicated region body
PF: predicated region fallthrough
CT: control target
= control target key end

     0   :  { %vm355_vm0 = vcmask 1044480   ;;  %vm356_vm1 = vcmask 1045504   ;;  %v1746_v1 = vmov 65535   ;;  %vm258_vm2 = vcmask 220160   ;;  %s2050_s0 = inlined_call_operand.vmem [shape: bf16[1,1,1,512,27], index: 0, kind: input, shape index: {}]   ;;  %s2051_s1 = inlined_call_operand.vmem [shape: bf16[1,27,128], index: 1, kind: input, shape index: {}]   ;;  %s2052_s2 = inlined_call_operand.vmem [shape: f32[1,128], index: 2, kind: input, shape index: {}]   ;;  %s2053_s3 = inlined_call_operand.vmem [shape: f32[1,128], index: 3, kind: input, shape index: {}]   ;;  %s2054_s4 = inlined_call_operand.hbm [shape: bf16[512,128], index: 4, kind: output, shape index: {}]  }
   0x1   :  { %v1690_v0 = vld [vmem:[%s2051_s1 + $0x8] sm:$0x3f]   ;;  %v357_v2 = vsel %vm355_vm0, 4294967295, %v1746_v1  ;;  %v1692_v3 = vld [vmem:[%s2050_s0] sm:$0xff]   ;;  %v1696_v10 = vld [vmem:[%s2050_s0 + $0x10] sm:$0xff]  }
   0x2   :  { %v358_v4 = vsel %vm356_vm1, %v357_v2, 0  ;;  %v1691_v6 = vld [vmem:[%s2051_s1] sm:$0xff]   ;;  %1618 = vmatprep.mubr.msk.bf16.mxu0 %vm258_vm2, %v1692_v3  ;;  %v1694_v8 = vld [vmem:[%s2050_s0 + $0x8] sm:$0xff]   ;;  %v1697_v11 = vld [vmem:[%s2050_s0 + $0x90] sm:$0xff]  }
   0x3   :  { %v360_v5 = vand.u32 %v1690_v0, %v358_v4  ;;  %v1693_v7 = vld [vmem:[%s2050_s0 + $0x80] sm:$0xff]   ;;  %v1695_v9 = vld [vmem:[%s2050_s0 + $0x88] sm:$0xff]   ;;  %v1698_v12 = vld [vmem:[%s2050_s0 + $0x18] sm:$0xff]  }
   0x4   :  { %1650 = vmatprep.mubr.msk.bf16.mxu1 %vm258_vm2, %v1693_v7  ;;  %v1699_v13 = vld [vmem:[%s2050_s0 + $0x98] sm:$0xff]   ;;  %v1700_v14 = vld [vmem:[%s2050_s0 + $0x20] sm:$0xff]   ;;  %v1702_v16 = vld [vmem:[%s2050_s0 + $0x28] sm:$0xff]  }
   0x5   :  { %1614 = vmatprep.subr.bf16.mxu0 %v360_v5  ;;  %1682 = vmatprep.subr.bf16.mxu1 %v360_v5  ;;  %v1701_v15 = vld [vmem:[%s2050_s0 + $0xa0] sm:$0xff]   ;;  %v1703_v17 = vld [vmem:[%s2050_s0 + $0xa8] sm:$0xff]   ;;  %v1704_v18 = vld [vmem:[%s2050_s0 + $0x30] sm:$0xff]  }
   0x6   :  { %1615 = vmatpush3.bf16.msra.mxu0 %v360_v5  ;;  %1684 = vmatpush3.bf16.msra.mxu1 %v360_v5  ;;  %v1705_v19 = vld [vmem:[%s2050_s0 + $0xb0] sm:$0xff]   ;;  %v1706_v20 = vld [vmem:[%s2050_s0 + $0x38] sm:$0xff]  }
   0x7   :  { %1616 = vmatprep.subr.bf16.mxu0 %v1691_v6  ;;  %1683 = vmatprep.subr.bf16.mxu1 %v1691_v6  ;;  %v1707_v21 = vld [vmem:[%s2050_s0 + $0xb8] sm:$0xff]  }
   0xa   :  { %1617 = vmatpush3.bf16.msra.mxu0 %v1691_v6  ;;  %1685 = vmatpush3.bf16.msra.mxu1 %v1691_v6 }
   0xd   :  { %1619 = vmatmul.mubr.msk.bf16.vlgmr.msra.gmra.mxu0 %vm258_vm2, %v1694_v8  ;;  %1651 = vmatmul.mubr.msk.bf16.vlgmr.msra.gmra.mxu1 %vm258_vm2, %v1695_v9 }
   0xe   :  { %1622 = vmatprep.mubr.msk.bf16.mxu0 %vm258_vm2, %v1696_v10  ;;  %1654 = vmatprep.mubr.msk.bf16.mxu1 %vm258_vm2, %v1697_v11 }
  0x15   :  { %1623 = vmatmul.mubr.msk.bf16.gmra.mxu0 %vm258_vm2, %v1698_v12  ;;  %1655 = vmatmul.mubr.msk.bf16.gmra.mxu1 %vm258_vm2, %v1699_v13 }
  0x16   :  { %1626 = vmatprep.mubr.msk.bf16.mxu0 %vm258_vm2, %v1700_v14  ;;  %1658 = vmatprep.mubr.msk.bf16.mxu1 %vm258_vm2, %v1701_v15 }
  0x1d   :  { %1627 = vmatmul.mubr.msk.bf16.gmra.mxu0 %vm258_vm2, %v1702_v16  ;;  %1659 = vmatmul.mubr.msk.bf16.gmra.mxu1 %vm258_vm2, %v1703_v17 }
  0x1e   :  { %1630 = vmatprep.mubr.msk.bf16.mxu0 %vm258_vm2, %v1704_v18  ;;  %1662 = vmatprep.mubr.msk.bf16.mxu1 %vm258_vm2, %v1705_v19 }
  0x1f   :  { %9 = vsyncpa [#allocation3], 0  ;;  %v1708_v22 = vld [vmem:[%s2050_s0 + $0x40] sm:$0xff]   ;;  %v1710_v24 = vld [vmem:[%s2050_s0 + $0x48] sm:$0xff]  }
  0x20   :  { %v1709_v23 = vld [vmem:[%s2050_s0 + $0xc0] sm:$0xff]   ;;  %v1711_v25 = vld [vmem:[%s2050_s0 + $0xc8] sm:$0xff]   ;;  %v1712_v26 = vld [vmem:[%s2050_s0 + $0x50] sm:$0xff]  }
  0x21   :  { %v1713_v27 = vld [vmem:[%s2050_s0 + $0xd0] sm:$0xff]   ;;  %v1714_v28 = vld [vmem:[%s2050_s0 + $0x58] sm:$0xff]   ;;  %v1716_v30 = vld [vmem:[%s2050_s0 + $0x60] sm:$0xff]  }
  0x22   :  { %v1715_v29 = vld [vmem:[%s2050_s0 + $0xd8] sm:$0xff]   ;;  %v1717_v31 = vld [vmem:[%s2050_s0 + $0xe0] sm:$0xff]   ;;  %v1718_v32 = vld [vmem:[%s2050_s0 + $0x68] sm:$0xff]  }
  0x23   :  { %v1719_v33 = vld [vmem:[%s2050_s0 + $0xe8] sm:$0xff]   ;;  %v1720_v34 = vld [vmem:[%s2050_s0 + $0x70] sm:$0xff]   ;;  %v1722_v36 = vld [vmem:[%s2050_s0 + $0x78] sm:$0xff]  }
  0x24   :  { %v1721_v35 = vld [vmem:[%s2050_s0 + $0xf0] sm:$0xff]   ;;  %v1723_v37 = vld [vmem:[%s2050_s0 + $0xf8] sm:$0xff]   ;;  %v1912_v38 = vld [vmem:[%s2052_s2] ss:$0 sm:$0xff]  ;;  %s1747_s0 = smov [#allocation2]  }
  0x25   :  { %1631 = vmatmul.mubr.msk.bf16.gmra.mxu0 %vm258_vm2, %v1706_v20  ;;  %1663 = vmatmul.mubr.msk.bf16.gmra.mxu1 %vm258_vm2, %v1707_v21  ;;  %v1919_v43 = vld [vmem:[%s2053_s3] ss:$0 sm:$0xff]  ;;  %s1182_s2 = sshll.u32 %s1747_s0, 4  ;;  %s1183_s2 = int_to_ptr.vmem [resolvable:$true] %s1182_s2 }
  0x26   :  { %1634 = vmatprep.mubr.msk.bf16.mxu0 %vm258_vm2, %v1708_v22  ;;  %1666 = vmatprep.mubr.msk.bf16.mxu1 %vm258_vm2, %v1709_v23  ;;  %s1724_s3 = scalar_lea.vmem %s1183_s2, 4096  ;;  %p1729_p1 = scmp.lt.s32.totalorder %s1183_s2, %s1183_s2 }
  0x27   :  { %p1725_p0 = scmp.ne.s32.totalorder %s1183_s2, %s1724_s3  ;;  %p1730_p2 = scmp.lt.s32.totalorder %s1724_s3, %s1724_s3 }
  0x29   :  { %p1731_p3 = por %p1730_p2, %p1729_p1 }
  0x2b   :  { %p1732_p4 = pnand %p1731_p3, %p1725_p0 }
  0x2d   :  { %1635 = vmatmul.mubr.msk.bf16.gmra.mxu0 %vm258_vm2, %v1710_v24  ;;  %1667 = vmatmul.mubr.msk.bf16.gmra.mxu1 %vm258_vm2, %v1711_v25 }
  0x2e   :  { %1638 = vmatprep.mubr.msk.bf16.mxu0 %vm258_vm2, %v1712_v26  ;;  %1670 = vmatprep.mubr.msk.bf16.mxu1 %vm258_vm2, %v1713_v27 }
  0x35   :  { %1639 = vmatmul.mubr.msk.bf16.gmra.mxu0 %vm258_vm2, %v1714_v28  ;;  %1671 = vmatmul.mubr.msk.bf16.gmra.mxu1 %vm258_vm2, %v1715_v29 }
  0x36   :  { %1642 = vmatprep.mubr.msk.bf16.mxu0 %vm258_vm2, %v1716_v30  ;;  %1674 = vmatprep.mubr.msk.bf16.mxu1 %vm258_vm2, %v1717_v31 }
  0x3d   :  { %1643 = vmatmul.mubr.msk.bf16.gmra.mxu0 %vm258_vm2, %v1718_v32  ;;  %1675 = vmatmul.mubr.msk.bf16.gmra.mxu1 %vm258_vm2, %v1719_v33 }
  0x3e   :  { %1646 = vmatprep.mubr.msk.bf16.mxu0 %vm258_vm2, %v1720_v34  ;;  %1678 = vmatprep.mubr.msk.bf16.mxu1 %vm258_vm2, %v1721_v35 }
  0x45   :  { %1647 = vmatmul.mubr.msk.bf16.gmra.mxu0 %vm258_vm2, %v1722_v36  ;;  %1679 = vmatmul.mubr.msk.bf16.gmra.mxu1 %vm258_vm2, %v1723_v37 }
  0xcd   :  { %v1620_v39 = vpop.f32.mrf.mxu0  ;;  %v1652_v40 = vpop.f32.mrf.mxu1 }
  0xce   :  { %v660_v41 = vmul.f32 %v1620_v39, %v1912_v38  ;;  %v692_v42 = vmul.f32 %v1652_v40, %v1912_v38 }
  0xcf   :  { %v396_v44 = vpop.f32.mrf.mxu0  ;;  %v524_v45 = vpop.f32.mrf.mxu1 }
  0xd0   :  { %v658_v46 = vmul.f32 %v1912_v38, %v396_v44  ;;  %v690_v47 = vmul.f32 %v1912_v38, %v524_v45  ;;  %v731_v50 = vadd.f32 %v1919_v43, %v660_v41  ;;  %v763_v51 = vadd.f32 %v1919_v43, %v692_v42 }
  0xd1   :  { %v1621_v48 = vpop.f32.mrf.mxu0  ;;  %v1653_v49 = vpop.f32.mrf.mxu1 }
  0xd2   :  { %v661_v52 = vmul.f32 %v1621_v48, %v1912_v38  ;;  %v693_v53 = vmul.f32 %v1653_v49, %v1912_v38  ;;  %v729_v56 = vadd.f32 %v1919_v43, %v658_v46  ;;  %v761_v57 = vadd.f32 %v1919_v43, %v690_v47 }
  0xd3   :  { %v399_v54 = vpop.f32.mrf.mxu0  ;;  %v527_v55 = vpop.f32.mrf.mxu1  ;;  %v795_v0 = vmax.f32 %v731_v50, 0.0  ;;  %v827_v1 = vmax.f32 %v763_v51, 0.0 }
  0xd4   :  { %v659_v58 = vmul.f32 %v1912_v38, %v399_v54  ;;  %v691_v59 = vmul.f32 %v1912_v38, %v527_v55  ;;  %v732_v60 = vadd.f32 %v1919_v43, %v661_v52  ;;  %v764_v61 = vadd.f32 %v1919_v43, %v693_v53 }
  0xd5   :  { %v1624_v62 = vpop.f32.mrf.mxu0  ;;  %v1656_v63 = vpop.f32.mrf.mxu1  ;;  %v793_v10 = vmax.f32 %v729_v56, 0.0  ;;  %v825_v11 = vmax.f32 %v761_v57, 0.0 }
  0xd6   :  { %v730_v2 = vadd.f32 %v1919_v43, %v659_v58  ;;  %v762_v3 = vadd.f32 %v1919_v43, %v691_v59  ;;  %v796_v4 = vmax.f32 %v732_v60, 0.0  ;;  %v828_v5 = vmax.f32 %v764_v61, 0.0 }
  0xd7   :  { %v664_v6 = vmul.f32 %v1624_v62, %v1912_v38  ;;  %v696_v7 = vmul.f32 %v1656_v63, %v1912_v38  ;;  %v412_v8 = vpop.f32.mrf.mxu0  ;;  %v540_v9 = vpop.f32.mrf.mxu1 }
  0xd8   :  { %v794_v12 = vmax.f32 %v730_v2, 0.0  ;;  %v826_v13 = vmax.f32 %v762_v3, 0.0  ;;  %v1397_v14 = vpack.c.bf16 %v796_v4, %v795_v0  ;;  %v1477_v15 = vpack.c.bf16 %v828_v5, %v827_v1 }
  0xd9   :  { %v662_v16 = vmul.f32 %v1912_v38, %v412_v8  ;;  %v694_v17 = vmul.f32 %v1912_v38, %v540_v9  ;;  %v1625_v18 = vpop.f32.mrf.mxu0  ;;  %v1657_v19 = vpop.f32.mrf.mxu1  ;;  %v735_v22 = vadd.f32 %v1919_v43, %v664_v6  ;;  %v767_v23 = vadd.f32 %v1919_v43, %v696_v7 }
  0xda   :  { %v1392_v20 = vpack.c.bf16 %v794_v12, %v793_v10  ;;  %v1472_v21 = vpack.c.bf16 %v826_v13, %v825_v11  ;;  %1549 = vst [vmem:[#allocation2 + $0x8] sm:$0xff] %v1397_v14   ;;  %1565 = vst [vmem:[#allocation2 + $0x88] sm:$0xff] %v1477_v15   ;;  %v665_v24 = vmul.f32 %v1625_v18, %v1912_v38 }
  0xdb   :  { %v697_v25 = vmul.f32 %v1657_v19, %v1912_v38  ;;  %v415_v26 = vpop.f32.mrf.mxu0  ;;  %v543_v27 = vpop.f32.mrf.mxu1  ;;  %v733_v28 = vadd.f32 %v1919_v43, %v662_v16  ;;  %v765_v29 = vadd.f32 %v1919_v43, %v694_v17  ;;  %v799_v41 = vmax.f32 %v735_v22, 0.0 }
  0xdc   :  { %1393 = vst [vmem:[#allocation2] sm:$0xff] %v1392_v20   ;;  %1564 = vst [vmem:[#allocation2 + $0x80] sm:$0xff] %v1472_v21   ;;  %v663_v30 = vmul.f32 %v1912_v38, %v415_v26  ;;  %v695_v31 = vmul.f32 %v1912_v38, %v543_v27  ;;  %v736_v32 = vadd.f32 %v1919_v43, %v665_v24  ;;  %v831_v42 = vmax.f32 %v767_v23, 0.0 }
  0xdd   :  { %v768_v33 = vadd.f32 %v1919_v43, %v697_v25  ;;  %v1628_v34 = vpop.f32.mrf.mxu0  ;;  %v1660_v35 = vpop.f32.mrf.mxu1  ;;  %v797_v48 = vmax.f32 %v733_v28, 0.0  ;;  %v829_v49 = vmax.f32 %v765_v29, 0.0 }
  0xde   :  { %v734_v36 = vadd.f32 %v1919_v43, %v663_v30  ;;  %v766_v37 = vadd.f32 %v1919_v43, %v695_v31  ;;  %v668_v39 = vmul.f32 %v1628_v34, %v1912_v38  ;;  %v700_v40 = vmul.f32 %v1660_v35, %v1912_v38 }
  0xdf   :  { %v800_v44 = vmax.f32 %v736_v32, 0.0  ;;  %v832_v45 = vmax.f32 %v768_v33, 0.0  ;;  %v428_v46 = vpop.f32.mrf.mxu0  ;;  %v556_v47 = vpop.f32.mrf.mxu1 }
  0xe0   :  { %v798_v50 = vmax.f32 %v734_v36, 0.0  ;;  %v830_v51 = vmax.f32 %v766_v37, 0.0  ;;  %v666_v54 = vmul.f32 %v1912_v38, %v428_v46  ;;  %v698_v55 = vmul.f32 %v1912_v38, %v556_v47 }
  0xe1   :  { %v1407_v52 = vpack.c.bf16 %v800_v44, %v799_v41  ;;  %v1487_v53 = vpack.c.bf16 %v832_v45, %v831_v42  ;;  %v1629_v56 = vpop.f32.mrf.mxu0  ;;  %v1661_v57 = vpop.f32.mrf.mxu1  ;;  %v739_v60 = vadd.f32 %v1919_v43, %v668_v39  ;;  %v771_v61 = vadd.f32 %v1919_v43, %v700_v40 }
  0xe2   :  { %v1402_v58 = vpack.c.bf16 %v798_v50, %v797_v48  ;;  %v1482_v59 = vpack.c.bf16 %v830_v51, %v829_v49  ;;  %v669_v62 = vmul.f32 %v1629_v56, %v1912_v38  ;;  %v701_v63 = vmul.f32 %v1661_v57, %v1912_v38 }
  0xe3   :  { %1551 = vst [vmem:[#allocation2 + $0x18] sm:$0xff] %v1407_v52   ;;  %1567 = vst [vmem:[#allocation2 + $0x98] sm:$0xff] %v1487_v53   ;;  %v431_v0 = vpop.f32.mrf.mxu0  ;;  %v559_v1 = vpop.f32.mrf.mxu1  ;;  %v737_v2 = vadd.f32 %v1919_v43, %v666_v54  ;;  %v769_v3 = vadd.f32 %v1919_v43, %v698_v55  ;;  %v803_v10 = vmax.f32 %v739_v60, 0.0  ;;  %v835_v11 = vmax.f32 %v771_v61, 0.0 }
  0xe4   :  { %1550 = vst [vmem:[#allocation2 + $0x10] sm:$0xff] %v1402_v58   ;;  %1566 = vst [vmem:[#allocation2 + $0x90] sm:$0xff] %v1482_v59   ;;  %v667_v4 = vmul.f32 %v1912_v38, %v431_v0  ;;  %v699_v5 = vmul.f32 %v1912_v38, %v559_v1  ;;  %v740_v6 = vadd.f32 %v1919_v43, %v669_v62 }
  0xe5   :  { %v772_v7 = vadd.f32 %v1919_v43, %v701_v63  ;;  %v1632_v8 = vpop.f32.mrf.mxu0  ;;  %v1664_v9 = vpop.f32.mrf.mxu1  ;;  %v801_v20 = vmax.f32 %v737_v2, 0.0  ;;  %v833_v21 = vmax.f32 %v769_v3, 0.0 }
  0xe6   :  { %v738_v12 = vadd.f32 %v1919_v43, %v667_v4  ;;  %v770_v13 = vadd.f32 %v1919_v43, %v699_v5  ;;  %v804_v14 = vmax.f32 %v740_v6, 0.0  ;;  %v672_v16 = vmul.f32 %v1632_v8, %v1912_v38 }
  0xe7   :  { %v836_v15 = vmax.f32 %v772_v7, 0.0  ;;  %v704_v17 = vmul.f32 %v1664_v9, %v1912_v38  ;;  %v444_v18 = vpop.f32.mrf.mxu0  ;;  %v572_v19 = vpop.f32.mrf.mxu1 }
  0xe8   :  { %v802_v22 = vmax.f32 %v738_v12, 0.0  ;;  %v834_v23 = vmax.f32 %v770_v13, 0.0  ;;  %v1417_v24 = vpack.c.bf16 %v804_v14, %v803_v10  ;;  %v670_v26 = vmul.f32 %v1912_v38, %v444_v18 }
  0xe9   :  { %v1497_v25 = vpack.c.bf16 %v836_v15, %v835_v11  ;;  %v702_v27 = vmul.f32 %v1912_v38, %v572_v19  ;;  %v1633_v28 = vpop.f32.mrf.mxu0  ;;  %v1665_v29 = vpop.f32.mrf.mxu1  ;;  %v743_v32 = vadd.f32 %v1919_v43, %v672_v16  ;;  %v775_v33 = vadd.f32 %v1919_v43, %v704_v17 }
  0xea   :  { %v1412_v30 = vpack.c.bf16 %v802_v22, %v801_v20  ;;  %v1492_v31 = vpack.c.bf16 %v834_v23, %v833_v21  ;;  %1553 = vst [vmem:[#allocation2 + $0x28] sm:$0xff] %v1417_v24   ;;  %v673_v34 = vmul.f32 %v1633_v28, %v1912_v38  ;;  %v705_v35 = vmul.f32 %v1665_v29, %v1912_v38 }
  0xeb   :  { %1569 = vst [vmem:[#allocation2 + $0xa8] sm:$0xff] %v1497_v25   ;;  %v447_v36 = vpop.f32.mrf.mxu0  ;;  %v575_v37 = vpop.f32.mrf.mxu1  ;;  %v741_v39 = vadd.f32 %v1919_v43, %v670_v26  ;;  %v773_v40 = vadd.f32 %v1919_v43, %v702_v27  ;;  %v807_v52 = vmax.f32 %v743_v32, 0.0  ;;  %v839_v53 = vmax.f32 %v775_v33, 0.0 }
  0xec   :  { %1552 = vst [vmem:[#allocation2 + $0x20] sm:$0xff] %v1412_v30   ;;  %1568 = vst [vmem:[#allocation2 + $0xa0] sm:$0xff] %v1492_v31   ;;  %v671_v41 = vmul.f32 %v1912_v38, %v447_v36  ;;  %v703_v42 = vmul.f32 %v1912_v38, %v575_v37  ;;  %v744_v44 = vadd.f32 %v1919_v43, %v673_v34 }
  0xed   :  { %v776_v45 = vadd.f32 %v1919_v43, %v705_v35  ;;  %v1636_v46 = vpop.f32.mrf.mxu0  ;;  %v1668_v47 = vpop.f32.mrf.mxu1  ;;  %v805_v58 = vmax.f32 %v741_v39, 0.0  ;;  %v837_v59 = vmax.f32 %v773_v40, 0.0 }
  0xee   :  { %v742_v48 = vadd.f32 %v1919_v43, %v671_v41  ;;  %v774_v49 = vadd.f32 %v1919_v43, %v703_v42  ;;  %v676_v50 = vmul.f32 %v1636_v46, %v1912_v38  ;;  %v708_v51 = vmul.f32 %v1668_v47, %v1912_v38 }
  0xef   :  { %v808_v54 = vmax.f32 %v744_v44, 0.0  ;;  %v840_v55 = vmax.f32 %v776_v45, 0.0  ;;  %v460_v56 = vpop.f32.mrf.mxu0  ;;  %v588_v57 = vpop.f32.mrf.mxu1 }
  0xf0   :  { %v806_v60 = vmax.f32 %v742_v48, 0.0  ;;  %v838_v61 = vmax.f32 %v774_v49, 0.0  ;;  %v674_v0 = vmul.f32 %v1912_v38, %v460_v56  ;;  %v706_v1 = vmul.f32 %v1912_v38, %v588_v57 }
  0xf1   :  { %v1427_v62 = vpack.c.bf16 %v808_v54, %v807_v52  ;;  %v1507_v63 = vpack.c.bf16 %v840_v55, %v839_v53  ;;  %v1637_v2 = vpop.f32.mrf.mxu0  ;;  %v1669_v3 = vpop.f32.mrf.mxu1  ;;  %v747_v6 = vadd.f32 %v1919_v43, %v676_v50  ;;  %v779_v7 = vadd.f32 %v1919_v43, %v708_v51 }
  0xf2   :  { %v1422_v4 = vpack.c.bf16 %v806_v60, %v805_v58  ;;  %v1502_v5 = vpack.c.bf16 %v838_v61, %v837_v59  ;;  %v677_v8 = vmul.f32 %v1637_v2, %v1912_v38  ;;  %v709_v9 = vmul.f32 %v1669_v3, %v1912_v38 }
  0xf3   :  { %1555 = vst [vmem:[#allocation2 + $0x38] sm:$0xff] %v1427_v62   ;;  %1571 = vst [vmem:[#allocation2 + $0xb8] sm:$0xff] %v1507_v63   ;;  %v463_v10 = vpop.f32.mrf.mxu0  ;;  %v591_v11 = vpop.f32.mrf.mxu1  ;;  %v745_v12 = vadd.f32 %v1919_v43, %v674_v0  ;;  %v777_v13 = vadd.f32 %v1919_v43, %v706_v1  ;;  %v811_v20 = vmax.f32 %v747_v6, 0.0  ;;  %v843_v21 = vmax.f32 %v779_v7, 0.0 }
  0xf4   :  { %1554 = vst [vmem:[#allocation2 + $0x30] sm:$0xff] %v1422_v4   ;;  %1570 = vst [vmem:[#allocation2 + $0xb0] sm:$0xff] %v1502_v5   ;;  %v675_v14 = vmul.f32 %v1912_v38, %v463_v10  ;;  %v707_v15 = vmul.f32 %v1912_v38, %v591_v11  ;;  %v748_v16 = vadd.f32 %v1919_v43, %v677_v8 }
  0xf5   :  { %v780_v17 = vadd.f32 %v1919_v43, %v709_v9  ;;  %v1640_v18 = vpop.f32.mrf.mxu0  ;;  %v1672_v19 = vpop.f32.mrf.mxu1  ;;  %v809_v30 = vmax.f32 %v745_v12, 0.0  ;;  %v841_v31 = vmax.f32 %v777_v13, 0.0 }
  0xf6   :  { %v746_v22 = vadd.f32 %v1919_v43, %v675_v14  ;;  %v778_v23 = vadd.f32 %v1919_v43, %v707_v15  ;;  %v812_v24 = vmax.f32 %v748_v16, 0.0  ;;  %v680_v26 = vmul.f32 %v1640_v18, %v1912_v38 }
  0xf7   :  { %v844_v25 = vmax.f32 %v780_v17, 0.0  ;;  %v712_v27 = vmul.f32 %v1672_v19, %v1912_v38  ;;  %v476_v28 = vpop.f32.mrf.mxu0  ;;  %v604_v29 = vpop.f32.mrf.mxu1 }
  0xf8   :  { %v810_v32 = vmax.f32 %v746_v22, 0.0  ;;  %v842_v33 = vmax.f32 %v778_v23, 0.0  ;;  %v1437_v34 = vpack.c.bf16 %v812_v24, %v811_v20  ;;  %v678_v36 = vmul.f32 %v1912_v38, %v476_v28 }
  0xf9   :  { %v1517_v35 = vpack.c.bf16 %v844_v25, %v843_v21  ;;  %v710_v37 = vmul.f32 %v1912_v38, %v604_v29  ;;  %v1641_v39 = vpop.f32.mrf.mxu0  ;;  %v1673_v40 = vpop.f32.mrf.mxu1  ;;  %v751_v44 = vadd.f32 %v1919_v43, %v680_v26  ;;  %v783_v45 = vadd.f32 %v1919_v43, %v712_v27 }
  0xfa   :  { %v1432_v41 = vpack.c.bf16 %v810_v32, %v809_v30  ;;  %v1512_v42 = vpack.c.bf16 %v842_v33, %v841_v31  ;;  %1557 = vst [vmem:[#allocation2 + $0x48] sm:$0xff] %v1437_v34   ;;  %v681_v46 = vmul.f32 %v1641_v39, %v1912_v38  ;;  %v713_v47 = vmul.f32 %v1673_v40, %v1912_v38 }
  0xfb   :  { %1573 = vst [vmem:[#allocation2 + $0xc8] sm:$0xff] %v1517_v35   ;;  %v479_v48 = vpop.f32.mrf.mxu0  ;;  %v607_v49 = vpop.f32.mrf.mxu1  ;;  %v749_v50 = vadd.f32 %v1919_v43, %v678_v36  ;;  %v781_v51 = vadd.f32 %v1919_v43, %v710_v37  ;;  %v815_v62 = vmax.f32 %v751_v44, 0.0  ;;  %v847_v63 = vmax.f32 %v783_v45, 0.0 }
  0xfc   :  { %1556 = vst [vmem:[#allocation2 + $0x40] sm:$0xff] %v1432_v41   ;;  %1572 = vst [vmem:[#allocation2 + $0xc0] sm:$0xff] %v1512_v42   ;;  %v679_v52 = vmul.f32 %v1912_v38, %v479_v48  ;;  %v711_v53 = vmul.f32 %v1912_v38, %v607_v49  ;;  %v752_v54 = vadd.f32 %v1919_v43, %v681_v46 }
  0xfd   :  { %v784_v55 = vadd.f32 %v1919_v43, %v713_v47  ;;  %v1644_v56 = vpop.f32.mrf.mxu0  ;;  %v1676_v57 = vpop.f32.mrf.mxu1  ;;  %v813_v4 = vmax.f32 %v749_v50, 0.0  ;;  %v845_v5 = vmax.f32 %v781_v51, 0.0 }
  0xfe   :  { %v750_v58 = vadd.f32 %v1919_v43, %v679_v52  ;;  %v782_v59 = vadd.f32 %v1919_v43, %v711_v53  ;;  %v684_v60 = vmul.f32 %v1644_v56, %v1912_v38  ;;  %v716_v61 = vmul.f32 %v1676_v57, %v1912_v38 }
  0xff   :  { %v816_v0 = vmax.f32 %v752_v54, 0.0  ;;  %v848_v1 = vmax.f32 %v784_v55, 0.0  ;;  %v492_v2 = vpop.f32.mrf.mxu0  ;;  %v620_v3 = vpop.f32.mrf.mxu1 }
 0x100   :  { %v814_v6 = vmax.f32 %v750_v58, 0.0  ;;  %v846_v7 = vmax.f32 %v782_v59, 0.0  ;;  %v682_v10 = vmul.f32 %v1912_v38, %v492_v2  ;;  %v714_v11 = vmul.f32 %v1912_v38, %v620_v3 }
 0x101   :  { %v1447_v8 = vpack.c.bf16 %v816_v0, %v815_v62  ;;  %v1527_v9 = vpack.c.bf16 %v848_v1, %v847_v63  ;;  %v1645_v12 = vpop.f32.mrf.mxu0  ;;  %v1677_v13 = vpop.f32.mrf.mxu1  ;;  %v755_v16 = vadd.f32 %v1919_v43, %v684_v60  ;;  %v787_v17 = vadd.f32 %v1919_v43, %v716_v61 }
 0x102   :  { %v1442_v14 = vpack.c.bf16 %v814_v6, %v813_v4  ;;  %v1522_v15 = vpack.c.bf16 %v846_v7, %v845_v5  ;;  %v685_v18 = vmul.f32 %v1645_v12, %v1912_v38  ;;  %v717_v19 = vmul.f32 %v1677_v13, %v1912_v38 }
 0x103   :  { %1559 = vst [vmem:[#allocation2 + $0x58] sm:$0xff] %v1447_v8   ;;  %1575 = vst [vmem:[#allocation2 + $0xd8] sm:$0xff] %v1527_v9   ;;  %v495_v20 = vpop.f32.mrf.mxu0  ;;  %v623_v21 = vpop.f32.mrf.mxu1  ;;  %v753_v22 = vadd.f32 %v1919_v43, %v682_v10  ;;  %v785_v23 = vadd.f32 %v1919_v43, %v714_v11  ;;  %v819_v30 = vmax.f32 %v755_v16, 0.0  ;;  %v851_v31 = vmax.f32 %v787_v17, 0.0 }
 0x104   :  { %1558 = vst [vmem:[#allocation2 + $0x50] sm:$0xff] %v1442_v14   ;;  %1574 = vst [vmem:[#allocation2 + $0xd0] sm:$0xff] %v1522_v15   ;;  %v683_v24 = vmul.f32 %v1912_v38, %v495_v20  ;;  %v715_v25 = vmul.f32 %v1912_v38, %v623_v21  ;;  %v756_v26 = vadd.f32 %v1919_v43, %v685_v18 }
 0x105   :  { %v788_v27 = vadd.f32 %v1919_v43, %v717_v19  ;;  %v1648_v28 = vpop.f32.mrf.mxu0  ;;  %v1680_v29 = vpop.f32.mrf.mxu1  ;;  %v817_v41 = vmax.f32 %v753_v22, 0.0  ;;  %v849_v42 = vmax.f32 %v785_v23, 0.0 }
 0x106   :  { %v754_v32 = vadd.f32 %v1919_v43, %v683_v24  ;;  %v786_v33 = vadd.f32 %v1919_v43, %v715_v25  ;;  %v820_v34 = vmax.f32 %v756_v26, 0.0  ;;  %v688_v36 = vmul.f32 %v1648_v28, %v1912_v38 }
 0x107   :  { %v852_v35 = vmax.f32 %v788_v27, 0.0  ;;  %v720_v37 = vmul.f32 %v1680_v29, %v1912_v38  ;;  %v508_v39 = vpop.f32.mrf.mxu0  ;;  %v636_v40 = vpop.f32.mrf.mxu1 }
 0x108   :  { %v818_v44 = vmax.f32 %v754_v32, 0.0  ;;  %v850_v45 = vmax.f32 %v786_v33, 0.0  ;;  %v1457_v46 = vpack.c.bf16 %v820_v34, %v819_v30  ;;  %v686_v48 = vmul.f32 %v1912_v38, %v508_v39 }
 0x109   :  { %v1537_v47 = vpack.c.bf16 %v852_v35, %v851_v31  ;;  %v718_v49 = vmul.f32 %v1912_v38, %v636_v40  ;;  %v1649_v50 = vpop.f32.mrf.mxu0  ;;  %v1681_v51 = vpop.f32.mrf.mxu1  ;;  %v759_v54 = vadd.f32 %v1919_v43, %v688_v36  ;;  %v791_v55 = vadd.f32 %v1919_v43, %v720_v37 }
 0x10a   :  { %v1452_v52 = vpack.c.bf16 %v818_v44, %v817_v41  ;;  %v1532_v53 = vpack.c.bf16 %v850_v45, %v849_v42  ;;  %1561 = vst [vmem:[#allocation2 + $0x68] sm:$0xff] %v1457_v46   ;;  %v689_v56 = vmul.f32 %v1649_v50, %v1912_v38  ;;  %v721_v57 = vmul.f32 %v1681_v51, %v1912_v38 }
 0x10b   :  { %1577 = vst [vmem:[#allocation2 + $0xe8] sm:$0xff] %v1537_v47   ;;  %v511_v58 = vpop.f32.mrf.mxu0  ;;  %v639_v59 = vpop.f32.mrf.mxu1  ;;  %v757_v60 = vadd.f32 %v1919_v43, %v686_v48  ;;  %v789_v61 = vadd.f32 %v1919_v43, %v718_v49  ;;  %v823_v4 = vmax.f32 %v759_v54, 0.0  ;;  %v855_v5 = vmax.f32 %v791_v55, 0.0 }
 0x10c   :  { %1560 = vst [vmem:[#allocation2 + $0x60] sm:$0xff] %v1452_v52   ;;  %1576 = vst [vmem:[#allocation2 + $0xe0] sm:$0xff] %v1532_v53   ;;  %v687_v62 = vmul.f32 %v1912_v38, %v511_v58  ;;  %v719_v63 = vmul.f32 %v1912_v38, %v639_v59  ;;  %v760_v0 = vadd.f32 %v1919_v43, %v689_v56 }
 0x10d   :  { %v792_v1 = vadd.f32 %v1919_v43, %v721_v57  ;;  %v821_v8 = vmax.f32 %v757_v60, 0.0  ;;  %v853_v9 = vmax.f32 %v789_v61, 0.0 }
 0x10e   :  { %v758_v2 = vadd.f32 %v1919_v43, %v687_v62  ;;  %v790_v3 = vadd.f32 %v1919_v43, %v719_v63  ;;  %v824_v6 = vmax.f32 %v760_v0, 0.0 }
 0x10f   :  { %v856_v7 = vmax.f32 %v792_v1, 0.0 }
 0x110   :  { %v822_v10 = vmax.f32 %v758_v2, 0.0  ;;  %v854_v11 = vmax.f32 %v790_v3, 0.0  ;;  %v1467_v12 = vpack.c.bf16 %v824_v6, %v823_v4 }
 0x111   :  { %v1547_v38 = vpack.c.bf16 %v856_v7, %v855_v5 }
 0x112   :  { %v1462_v13 = vpack.c.bf16 %v822_v10, %v821_v8  ;;  %v1542_v14 = vpack.c.bf16 %v854_v11, %v853_v9  ;;  %1563 = vst [vmem:[#allocation2 + $0x78] sm:$0xff] %v1467_v12  }
 0x113   :  { %1579 = vst [vmem:[#allocation2 + $0xf8] sm:$0xff] %v1547_v38  }
 0x114   :  { %1562 = vst [vmem:[#allocation2 + $0x70] sm:$0xff] %v1462_v13   ;;  %1578 = vst [vmem:[#allocation2 + $0xf0] sm:$0xff] %v1542_v14  }
 0x115   :  { %1735 = shalt.err (!%p1732_p4)
}
 0x116   :  { %s1748_s6 = smov 64   ;;  %s1749_s7 = smov 4  }
 0x117   :  { %1188 = dma.vmem_to_hbm [thread:$0]  %s1183_s2, 4096, %s2054_s4, [#allocation3], %s1748_s6, %s1748_s6, %s1749_s7  }
 0x118   :  { %1744 = dma.done.wait [#allocation3], 4096  }
 0x119   :  { %1745 = vsyncadd [#allocation3], 4294963200 }
 0x11a   :  { %1192 = vsyncpa [#allocation3], 1 }

</bundles_post_ra>
